<compile_context>
chip_gen: v7x
topology: tpu7x:2x2x1
jax: 0.10.0
libtpu: 0.0.40
codegen_flags: <defaults>
</compile_context>

<pallas_src>
import jax
import jax.numpy as jnp
from jax.experimental import pallas as pl
from jax.experimental.pallas import tpu as pltpu

# Flip to True on v7x (EUP vrcp in an otherwise slack slot); re-validate with
# rtol~1e-3 since the approx reciprocal feeds p^2 / (1-p)^2 in the focal weight.
_APPROX_RECIP = False
# Target bytes of pred+label data moved per grid step.
_TILE_TARGET_BYTES = 1 * 1024 * 1024


def _cls_pos_kernel(pred_ref, lab_ref, out_ref):
    # pred_ref: (Nb, Rb, L)     -- channel 0 of the logits for this slab.
    # lab_ref : (Nb, 3, Rb, L)  -- all three label channels for this slab.
    # out_ref : (1, 2) SMEM     -- partial [sum(focal_weight*bce), sum(positives)].
    x = pred_ref[...].astype(jnp.float32)
    lab = lab_ref[...].astype(jnp.float32)
    l0 = lab[:, 0]
    l1 = lab[:, 1]
    l2 = lab[:, 2]

    # BCEWithLogitsLoss(reduction='none'), numerically stable form:
    #   max(x, 0) - x*y + log(1 + exp(-|x|))
    e = jnp.exp(-jnp.abs(x))
    log_loss = jnp.maximum(x, 0.0) - x * l2 + jnp.log(1.0 + e)

    # sigmoid(x) and 1 - sigmoid(x), both reusing e and one reciprocal:
    #   x >= 0: p = 1/(1+e), 1-p = e/(1+e);  x < 0: swapped.
    inv = pl.reciprocal(1.0 + e, approx=_APPROX_RECIP)
    e_inv = e * inv
    nonneg = x >= 0.0
    p = jnp.where(nonneg, inv, e_inv)
    one_m_p = jnp.where(nonneg, e_inv, inv)

    positives = l2
    negatives = l1 - l2
    one_m_l0_sq = (1.0 - l0) * (1.0 - l0)
    fore_w = positives * one_m_p * one_m_p
    back_w = negatives * one_m_l0_sq * one_m_l0_sq * (p * p)
    focal_w = fore_w + back_w

    out_ref[0, 0] = jnp.sum(focal_w * log_loss)
    out_ref[0, 1] = jnp.sum(positives)


def _pick_row_block(n_rows, row_bytes):
    """Largest multiple-of-8 divisor of n_rows that fits the per-step budget."""
    if n_rows * row_bytes <= _TILE_TARGET_BYTES:
        return n_rows
    best = 0
    for d in range(8, n_rows, 8):
        if n_rows % d == 0 and d * row_bytes <= _TILE_TARGET_BYTES and d > best:
            best = d
    # TODO(synk): if n_rows has no multiple-of-8 divisor under the budget we
    # fall back to a full-row slab; extremely large maps may then need more VMEM.
    return best if best else n_rows


def _pick_batch_block(n, per_image_bytes):
    """Largest divisor of N whose combined slab still fits the budget."""
    nb = 1
    for d in range(1, n + 1):
        if n % d == 0 and d * per_image_bytes <= _TILE_TARGET_BYTES:
            nb = d
    return nb


def cls_pos_loss(pos_pred, pos_label):
    """pos_pred: (N, Cp, H, W) logits (channel 0 used); pos_label: (N, 3, H, W).

    Returns the scalar CSPHead classification focal loss.  Inputs may be
    float32 or bfloat16 (upcast happens inside the kernel).
    """
    N, Cp, H, W = pos_pred.shape
    assert pos_label.shape == (N, 3, H, W)

    # Lane-dense spatial layout: if H*W folds into whole 128-lane rows, reshape
    # the contiguous NCHW tensors (free) so no vreg lanes are masked when W<128.
    S = H * W
    if S % 128 == 0:
        L, R = 128, S // 128
        pred = pos_pred.reshape(N, Cp, R, L)
        lab = pos_label.reshape(N, 3, R, L)
    else:
        L, R = W, H
        pred, lab = pos_pred, pos_label

    row_bytes = L * (pred.dtype.itemsize + 3 * lab.dtype.itemsize)

    # Row tiling (bounded VMEM) and batch blocking (big per-step slabs).
    r_blk = _pick_row_block(R, row_bytes)
    num_sb = R // r_blk
    nb = _pick_batch_block(N, R * row_bytes) if num_sb == 1 else 1
    num_bb = N // nb

    step_bytes = nb * r_blk * row_bytes
    # Right-size scoped VMEM: double-buffered inputs + f32 elementwise
    # temporaries, instead of blanket-reserving half of v7x's scratchpad.
    vmem_limit = int(min(32 * 1024 * 1024, max(8 * 1024 * 1024, 12 * step_bytes)))

    pred_spec = pl.BlockSpec((nb, pl.Squeezed(), r_blk, L),
                             lambda b, r: (b, 0, r, 0))
    lab_spec = pl.BlockSpec((nb, 3, r_blk, L),
                            lambda b, r: (b, 0, r, 0))
    out_spec = pl.BlockSpec((1, 2), lambda b, r: (b * num_sb + r, 0),
                            memory_space=pltpu.SMEM)

    def run(batch_sem):
        return pl.pallas_call(
            _cls_pos_kernel,
            out_shape=jax.ShapeDtypeStruct((num_bb * num_sb, 2), jnp.float32),
            grid_spec=pltpu.PrefetchScalarGridSpec(
                num_scalar_prefetch=0,
                grid=(num_bb, num_sb),
                in_specs=[pred_spec, lab_spec],
                out_specs=out_spec,
            ),
            compiler_params=pltpu.CompilerParams(
                dimension_semantics=(batch_sem, pltpu.ARBITRARY),
                vmem_limit_bytes=vmem_limit,
            ),
        )(pred, lab)

    # v7x has two TensorCores; only CORE_PARALLEL actually shards the grid
    # across them.  Gate on device kind and keep a safe fallback so the kernel
    # always runs on single-TC generations (v5e/v6e) and older chips.
    kind = jax.devices()[0].device_kind.lower()
    if "v7" in kind and num_bb % 2 == 0 and num_bb > 1:
        try:
            partials = jax.block_until_ready(run(pltpu.CORE_PARALLEL))
        except Exception:
            partials = run(pltpu.PARALLEL)
    else:
        partials = run(pltpu.PARALLEL)

    sums = jnp.sum(partials, axis=0)
    return sums[0] / jnp.maximum(1.0, sums[1])


def _reference(pos_pred, pos_label):
    x = pos_pred[:, 0].astype(jnp.float32)
    l0 = pos_label[:, 0].astype(jnp.float32)
    l1 = pos_label[:, 1].astype(jnp.float32)
    l2 = pos_label[:, 2].astype(jnp.float32)
    log_loss = jnp.maximum(x, 0.0) - x * l2 + jnp.log1p(jnp.exp(-jnp.abs(x)))
    p = jax.nn.sigmoid(x)
    fore = l2 * (1.0 - p) ** 2
    back = (l1 - l2) * (1.0 - l0) ** 4 * p ** 2
    return jnp.sum((fore + back) * log_loss) / jnp.maximum(1.0, jnp.sum(l2))


def _make_inputs(key, N, H, W, lab_dtype):
    k1, k2, k3 = jax.random.split(key, 3)
    # pos_pred: raw logits, channel 0 used by the loss.
    pos_pred = jax.random.normal(k1, (N, 1, H, W), dtype=jnp.float32)
    # pos_label: ch0 = gaussian-ish soft map in [0,1], ch1 = valid mask,
    # ch2 = positive-center mask (subset of ch1).
    soft = jax.random.uniform(k2, (N, 1, H, W), dtype=jnp.float32)
    pos_mask = (jax.random.uniform(k3, (N, 1, H, W)) > 0.9).astype(jnp.float32)
    valid = jnp.ones((N, 1, H, W), dtype=jnp.float32)
    pos_label = jnp.concatenate([soft, valid, pos_mask], axis=1).astype(lab_dtype)
    return pos_pred, pos_label


if __name__ == "__main__":
    key = jax.random.PRNGKey(0)
    cases = [
        (2, 16, 16, jnp.float32),   # H*W % 128 == 0 -> lane-dense flattened path
        (2, 16, 20, jnp.float32),   # W=20            -> full (H, W) slab path
        (2, 16, 16, jnp.bfloat16),  # bf16 labels from producer, in-kernel upcast
    ]
    keys = jax.random.split(key, len(cases))
    for k, (N, H, W, ldt) in zip(keys, cases):
        pp, pld = _make_inputs(k, N, H, W, ldt)
        loss = jax.block_until_ready(cls_pos_loss(pp, pld))
        ref = _reference(pp, pld)
        assert jnp.allclose(loss, ref, rtol=1e-4, atol=1e-5), (N, H, W, ldt, loss, ref)
    print("KERNEL_OK")
</pallas_src>

<mosaic_0001>
module attributes {stable_mosaic.version = 11 : i64} {
  func.func @_cls_pos_kernel(%arg0: i32, %arg1: i32, %arg2: memref<2x1x2x128xf32, #tpu.memory_space<vmem>>, %arg3: memref<2x3x2x128xf32, #tpu.memory_space<vmem>>, %arg4: memref<1x2xf32, #tpu.memory_space<smem>>) attributes {dimension_semantics = [#tpu.dimension_semantics<parallel>, #tpu.dimension_semantics<arbitrary>], iteration_bounds = array<i64: 1, 1>, scalar_prefetch = 0 : i64, scratch_operands = 0 : i64, tpu.core_type = #tpu.core_type<tc>, window_params = [{transform_indices = @transform_0, window_bounds = array<i64: 2, 1, 2, 128>}, {transform_indices = @transform_1, window_bounds = array<i64: 2, 3, 2, 128>}, {transform_indices = @transform_2, window_bounds = array<i64: 1, 2>}]} {
    %c0 = arith.constant 0 : index
    %c0_0 = arith.constant 0 : index
    %c0_1 = arith.constant 0 : index
    %c0_2 = arith.constant 0 : index
    %0 = vector.load %arg2[%c0, %c0_0, %c0_1, %c0_2] : memref<2x1x2x128xf32, #tpu.memory_space<vmem>>, vector<2x1x2x128xf32>
    %1 = vector.shape_cast %0 : vector<2x1x2x128xf32> to vector<2x2x128xf32>
    %c0_3 = arith.constant 0 : index
    %c0_4 = arith.constant 0 : index
    %c0_5 = arith.constant 0 : index
    %c0_6 = arith.constant 0 : index
    %2 = vector.load %arg3[%c0_3, %c0_4, %c0_5, %c0_6] : memref<2x3x2x128xf32, #tpu.memory_space<vmem>>, vector<2x3x2x128xf32>
    %3 = vector.extract_strided_slice %2 {offsets = [0, 0, 0, 0], sizes = [2, 1, 2, 128], strides = [1, 1, 1, 1]} : vector<2x3x2x128xf32> to vector<2x1x2x128xf32>
    %4 = vector.shape_cast %3 : vector<2x1x2x128xf32> to vector<2x2x128xf32>
    %5 = vector.extract_strided_slice %2 {offsets = [0, 1, 0, 0], sizes = [2, 1, 2, 128], strides = [1, 1, 1, 1]} : vector<2x3x2x128xf32> to vector<2x1x2x128xf32>
    %6 = vector.shape_cast %5 : vector<2x1x2x128xf32> to vector<2x2x128xf32>
    %7 = vector.extract_strided_slice %2 {offsets = [0, 2, 0, 0], sizes = [2, 1, 2, 128], strides = [1, 1, 1, 1]} : vector<2x3x2x128xf32> to vector<2x1x2x128xf32>
    %8 = vector.shape_cast %7 : vector<2x1x2x128xf32> to vector<2x2x128xf32>
    %9 = math.absf %1 : vector<2x2x128xf32>
    %cst = arith.constant 0.000000e+00 : f32
    %10 = vector.broadcast %cst : f32 to vector<2x2x128xf32>
    %11 = arith.subf %10, %9 : vector<2x2x128xf32>
    %12 = math.exp %11 : vector<2x2x128xf32>
    %cst_7 = arith.constant 0.000000e+00 : f32
    %13 = vector.broadcast %cst_7 : f32 to vector<2x2x128xf32>
    %14 = arith.maximumf %1, %13 : vector<2x2x128xf32>
    %15 = arith.mulf %1, %8 : vector<2x2x128xf32>
    %16 = arith.subf %14, %15 : vector<2x2x128xf32>
    %cst_8 = arith.constant 1.000000e+00 : f32
    %17 = vector.broadcast %cst_8 : f32 to vector<2x2x128xf32>
    %18 = arith.addf %17, %12 : vector<2x2x128xf32>
    %19 = math.log %18 : vector<2x2x128xf32>
    %20 = arith.addf %16, %19 : vector<2x2x128xf32>
    %cst_9 = arith.constant 1.000000e+00 : f32
    %21 = vector.broadcast %cst_9 : f32 to vector<2x2x128xf32>
    %22 = arith.addf %21, %12 : vector<2x2x128xf32>
    %23 = tpu.reciprocal %22 : vector<2x2x128xf32> -> vector<2x2x128xf32>
    %24 = arith.mulf %12, %23 : vector<2x2x128xf32>
    %cst_10 = arith.constant 0.000000e+00 : f32
    %25 = vector.broadcast %cst_10 : f32 to vector<2x2x128xf32>
    %26 = arith.cmpf oge, %1, %25 : vector<2x2x128xf32>
    %27 = arith.select %26, %23, %24 : vector<2x2x128xi1>, vector<2x2x128xf32>
    %28 = arith.select %26, %24, %23 : vector<2x2x128xi1>, vector<2x2x128xf32>
    %29 = arith.subf %6, %8 : vector<2x2x128xf32>
    %cst_11 = arith.constant 1.000000e+00 : f32
    %30 = vector.broadcast %cst_11 : f32 to vector<2x2x128xf32>
    %31 = arith.subf %30, %4 : vector<2x2x128xf32>
    %cst_12 = arith.constant 1.000000e+00 : f32
    %32 = vector.broadcast %cst_12 : f32 to vector<2x2x128xf32>
    %33 = arith.subf %32, %4 : vector<2x2x128xf32>
    %34 = arith.mulf %31, %33 : vector<2x2x128xf32>
    %35 = arith.mulf %8, %28 : vector<2x2x128xf32>
    %36 = arith.mulf %35, %28 : vector<2x2x128xf32>
    %37 = arith.mulf %29, %34 : vector<2x2x128xf32>
    %38 = arith.mulf %37, %34 : vector<2x2x128xf32>
    %39 = arith.mulf %27, %27 : vector<2x2x128xf32>
    %40 = arith.mulf %38, %39 : vector<2x2x128xf32>
    %41 = arith.addf %36, %40 : vector<2x2x128xf32>
    %42 = arith.mulf %41, %20 : vector<2x2x128xf32>
    %43 = vector.shape_cast %42 : vector<2x2x128xf32> to vector<1x2x2x128xf32>
    %cst_13 = arith.constant dense<0.000000e+00> : vector<1xf32>
    %44 = vector.multi_reduction <add>, %43, %cst_13 [1, 2, 3] : vector<1x2x2x128xf32> to vector<1xf32>
    %45 = vector.shape_cast %44 : vector<1xf32> to vector<1x1x1x1xf32>
    %46 = vector.extract %45[0, 0, 0, 0] : f32 from vector<1x1x1x1xf32>
    %c0_14 = arith.constant 0 : index
    %c0_15 = arith.constant 0 : index
    %47 = memref.load %arg4[%c0_14, %c0_15] : memref<1x2xf32, #tpu.memory_space<smem>>
    memref.store %46, %arg4[%c0_14, %c0_15] : memref<1x2xf32, #tpu.memory_space<smem>>
    %48 = vector.shape_cast %8 : vector<2x2x128xf32> to vector<1x2x2x128xf32>
    %cst_16 = arith.constant dense<0.000000e+00> : vector<1xf32>
    %49 = vector.multi_reduction <add>, %48, %cst_16 [1, 2, 3] : vector<1x2x2x128xf32> to vector<1xf32>
    %50 = vector.shape_cast %49 : vector<1xf32> to vector<1x1x1x1xf32>
    %51 = vector.extract %50[0, 0, 0, 0] : f32 from vector<1x1x1x1xf32>
    %c0_17 = arith.constant 0 : index
    %c1 = arith.constant 1 : index
    %52 = memref.load %arg4[%c0_17, %c1] : memref<1x2xf32, #tpu.memory_space<smem>>
    memref.store %51, %arg4[%c0_17, %c1] : memref<1x2xf32, #tpu.memory_space<smem>>
    return
  }
  func.func @transform_0(%arg0: i32, %arg1: i32) -> (i32, i32, i32, i32) {
    %c0_i32 = arith.constant 0 : i32
    %c0_i32_0 = arith.constant 0 : i32
    %c0_i32_1 = arith.constant 0 : i32
    return %arg0, %c0_i32, %arg1, %c0_i32_0 : i32, i32, i32, i32
  }
  func.func @transform_1(%arg0: i32, %arg1: i32) -> (i32, i32, i32, i32) {
    %c0_i32 = arith.constant 0 : i32
    %c0_i32_0 = arith.constant 0 : i32
    %c0_i32_1 = arith.constant 0 : i32
    return %arg0, %c0_i32, %arg1, %c0_i32_0 : i32, i32, i32, i32
  }
  func.func @transform_2(%arg0: i32, %arg1: i32) -> (i32, i32) {
    %c1_i32 = arith.constant 1 : i32
    %0 = arith.muli %arg0, %c1_i32 : i32
    %1 = arith.addi %0, %arg1 : i32
    %c0_i32 = arith.constant 0 : i32
    %c0_i32_0 = arith.constant 0 : i32
    return %1, %c0_i32 : i32, i32
  }
}

</mosaic_0001>

<bundles_post_ra>
// kernel: tpu_custom_call.1
= control target key start
LH: loop header
LB: loop body
LE: loop exit
PB: predicated region body
PF: predicated region fallthrough
CT: control target
= control target key end

     0   :  { %7 = vsyncpa [#allocation3], 0  ;;  %s287_s0 = inlined_call_operand.hbm [shape: f32[2,1,2,128], index: 0, kind: input, shape index: {}]   ;;  %s288_s1 = inlined_call_operand.hbm [shape: f32[2,3,2,128], index: 1, kind: input, shape index: {}]   ;;  %s289_s2 = inlined_call_operand.hbm [shape: f32[1,2], index: 2, kind: output, shape index: {}]  }
   0x1   :  { %8 = vsyncpa [#allocation6], 0 }
   0x2   :  { %9 = vsyncpa [#allocation4], 0  ;;  %s231_s9 = smov [#allocation2]   ;;  %s171_s13 = scalar_lea.hbm %s287_s0, 64 }
   0x3   :  { %s15_s10 = sshll.u32 %s231_s9, 4  ;;  %p172_p0 = scmp.ne.s32.totalorder %s287_s0, %s171_s13  ;;  %s16_s10 = int_to_ptr.vmem [resolvable:$true] %s15_s10 }
   0x4   :  { %p175_p1 = scmp.lt.u32.totalorder %s171_s13, %s287_s0 }
   0x6   :  { %p177_p2 = pnand %p175_p1, %p172_p0 }
   0x8   :  { %180 = shalt.err (!%p177_p2)
}
   0x9   :  { %s181_s18 = scalar_lea.vmem %s16_s10, 64  ;;  %p186_p4 = scmp.lt.s32.totalorder %s16_s10, %s16_s10 }
   0xa   :  { %p182_p3 = scmp.ne.s32.totalorder %s16_s10, %s181_s18  ;;  %p187_p5 = scmp.lt.s32.totalorder %s181_s18, %s181_s18 }
   0xc   :  { %p188_p6 = por %p187_p5, %p186_p4 }
   0xe   :  { %p189_p7 = pnand %p188_p6, %p182_p3 }
  0x10   :  { %192 = shalt.err (!%p189_p7)
}
  0x11   :  { %s232_s19 = smov 32   ;;  %s233_s20 = smov 2  }
  0x12   :  { %21 = dma.hbm_to_vmem [thread:$0]  %s287_s0, 64, %s16_s10, [#allocation3], %s232_s19, %s232_s19, %s233_s20  }
  0x13   :  { %s234_s23 = smov [#allocation5]   ;;  %s193_s27 = scalar_lea.hbm %s288_s1, 192 }
  0x14   :  { %s27_s24 = sshll.u32 %s234_s23, 4  ;;  %p194_p8 = scmp.ne.s32.totalorder %s288_s1, %s193_s27  ;;  %s28_s24 = int_to_ptr.vmem [resolvable:$true] %s27_s24 }
  0x15   :  { %p197_p9 = scmp.lt.u32.totalorder %s193_s27, %s288_s1 }
  0x17   :  { %p199_p10 = pnand %p197_p9, %p194_p8 }
  0x19   :  { %202 = shalt.err (!%p199_p10)
}
  0x1a   :  { %s203_s4 = scalar_lea.vmem %s28_s24, 192  ;;  %p208_p12 = scmp.lt.s32.totalorder %s28_s24, %s28_s24 }
  0x1b   :  { %p204_p11 = scmp.ne.s32.totalorder %s28_s24, %s203_s4  ;;  %p209_p13 = scmp.lt.s32.totalorder %s203_s4, %s203_s4 }
  0x1d   :  { %p210_p0 = por %p209_p13, %p208_p12 }
  0x1f   :  { %p211_p1 = pnand %p210_p0, %p204_p11 }
  0x21   :  { %214 = shalt.err (!%p211_p1)
}
  0x22   :  { %33 = dma.hbm_to_vmem [thread:$0]  %s288_s1, 192, %s28_s24, [#allocation6], %s232_s19, %s232_s19, %s233_s20  }
  0x23   :  { %225 = dma.done.wait [#allocation3], 64  }
  0x24   :  { %226 = vsyncadd [#allocation3], 4294967232 }
  0x25   :  { %227 = dma.done.wait [#allocation6], 192  }
  0x26   :  { %228 = vsyncadd [#allocation6], 4294967104  ;;  %v41_v0 = vld [vmem:[#allocation2] sm:$0x3]  ;;  %v42_v1 = vld [vmem:[#allocation2 + $0x2] sm:$0x3] }
  0x27   :  { %v49_v2 = vand.u32 2147483647, %v41_v0  ;;  %v50_v3 = vand.u32 2147483647, %v42_v1  ;;  %v43_v11 = vld [vmem:[#allocation5] sm:$0x3] }
  0x28   :  { %v46_v13 = vld [vmem:[#allocation5 + $0x6] sm:$0x3]  ;;  %v83_v14 = vsub.f32 1.0, %v43_v11  ;;  %v44_v15 = vld [vmem:[#allocation5 + $0x2] sm:$0x3]  ;;  %v57_v24 = vmax.f32 %v41_v0, 0.0 }
  0x29   :  { %v51_v4 = vsub.f32 0.0, %v49_v2  ;;  %v52_v5 = vsub.f32 0.0, %v50_v3  ;;  %v45_v16 = vld [vmem:[#allocation5 + $0x4] sm:$0x3]  ;;  %v84_v17 = vsub.f32 1.0, %v46_v13  ;;  %v58_v27 = vmax.f32 %v42_v1, 0.0 }
  0x2a   :  { %v47_v18 = vld [vmem:[#allocation5 + $0x8] sm:$0x3]  ;;  %v48_v19 = vld [vmem:[#allocation5 + $0xa] sm:$0x3]  ;;  %v81_v20 = vsub.f32 %v44_v15, %v45_v16  ;;  %v85_v21 = vmul.f32 %v83_v14, %v83_v14  ;;  %v59_v25 = vmul.f32 %v45_v16, %v41_v0  ;;  %vm75_vm0 = vcmp.ge.f32.partialorder %v41_v0, 0.0  ;;  %s215_s9 = scalar_lea.hbm %s289_s2, 16 }
  0x2b   :  { %v53_v6 = vmul.f32 1.442695, %v51_v4  ;;  %v55_v7 = vmul.f32 1.442695, %v52_v5  ;;  %v82_v22 = vsub.f32 %v47_v18, %v48_v19  ;;  %v86_v23 = vmul.f32 %v84_v17, %v84_v17  ;;  %p216_p2 = scmp.ne.s32.totalorder %s289_s2, %s215_s9  ;;  %p219_p3 = scmp.lt.u32.totalorder %s215_s9, %s289_s2 }
  0x2c   :  { %v60_v28 = vmul.f32 %v48_v19, %v42_v1  ;;  %v91_v29 = vmul.f32 %v85_v21, %v81_v20  ;;  %v61_v34 = vsub.f32 %v57_v24, %v59_v25  ;;  %vm76_vm1 = vcmp.ge.f32.partialorder %v42_v1, 0.0 }
  0x2d   :  { %159 = vpow2.f32 %v53_v6  ;;  %v92_v31 = vmul.f32 %v86_v23, %v82_v22  ;;  %vm103_vm2 = vcmask 1041408   ;;  %p221_p4 = pnand %p219_p3, %p216_p2 }
  0x2e   :  { %161 = vpow2.f32 %v55_v7  ;;  %v62_v36 = vsub.f32 %v58_v27, %v60_v28  ;;  %v93_v39 = vmul.f32 %v91_v29, %v85_v21  ;;  %v118_v62 = vsel %vm103_vm2, %v45_v16, 0.0 }
  0x2f   :  { %v94_v43 = vmul.f32 %v92_v31, %v86_v23  ;;  %v119_v63 = vsel %vm103_vm2, %v48_v19, 0.0 }
  0x30   :  { %v120_v1 = vadd.f32 %v119_v63, %v118_v62 }
  0x37   :  { %v160_v8 = vpop.eup %159 }
  0x38   :  { %v162_v9 = vpop.eup %161  ;;  %v63_v10 = vadd.f32 1.0, %v160_v8 }
  0x39   :  { %v64_v12 = vadd.f32 1.0, %v162_v9 }
  0x3a   :  { %163 = vlog2.f32 %v63_v10 }
  0x3b   :  { %165 = vlog2.f32 %v64_v12 }
  0x3c   :  { %167 = vrcp.f32 %v63_v10 }
  0x3d   :  { %169 = vrcp.f32 %v64_v12 }
  0x44   :  { %v164_v26 = vpop.eup %163 }
  0x45   :  { %v166_v30 = vpop.eup %165  ;;  %v66_v37 = vmul.f32 0.6931472, %v164_v26 }
  0x46   :  { %v168_v32 = vpop.eup %167  ;;  %v68_v40 = vmul.f32 0.6931472, %v166_v30 }
  0x47   :  { %v170_v33 = vpop.eup %169  ;;  %v73_v35 = vmul.f32 %v168_v32, %v160_v8  ;;  %v69_v50 = vadd.f32 %v66_v37, %v61_v34 }
  0x48   :  { %v74_v38 = vmul.f32 %v170_v33, %v162_v9  ;;  %v70_v53 = vadd.f32 %v68_v40, %v62_v36 }
  0x49   :  { %v77_v41 = vsel %vm75_vm0, %v168_v32, %v73_v35  ;;  %v79_v42 = vsel %vm75_vm0, %v73_v35, %v168_v32 }
  0x4a   :  { %v78_v44 = vsel %vm76_vm1, %v170_v33, %v74_v38  ;;  %v80_v45 = vsel %vm76_vm1, %v74_v38, %v170_v33  ;;  %v87_v46 = vmul.f32 %v79_v42, %v45_v16  ;;  %v95_v47 = vmul.f32 %v77_v41, %v77_v41 }
  0x4b   :  { %v88_v48 = vmul.f32 %v80_v45, %v48_v19  ;;  %v96_v49 = vmul.f32 %v78_v44, %v78_v44 }
  0x4c   :  { %v89_v51 = vmul.f32 %v87_v46, %v79_v42  ;;  %v97_v52 = vmul.f32 %v95_v47, %v93_v39 }
  0x4d   :  { %v90_v54 = vmul.f32 %v88_v48, %v80_v45  ;;  %v98_v55 = vmul.f32 %v96_v49, %v94_v43 }
  0x4e   :  { %v99_v56 = vadd.f32 %v97_v52, %v89_v51 }
  0x4f   :  { %v100_v57 = vadd.f32 %v98_v55, %v90_v54 }
  0x50   :  { %v101_v58 = vmul.f32 %v99_v56, %v69_v50 }
  0x51   :  { %v102_v59 = vmul.f32 %v100_v57, %v70_v53 }
  0x52   :  { %v104_v60 = vsel %vm103_vm2, %v101_v58, 0.0 }
  0x53   :  { %v105_v61 = vsel %vm103_vm2, %v102_v59, 0.0 }
  0x54   :  { %v106_v0 = vadd.f32 %v105_v61, %v104_v60 }
  0x56   :  { %107 = vadd.xlane.f32.xlu0 %v106_v0 }
  0x5a   :  { %121 = vadd.xlane.f32.xlu0 %v120_v1 }
  0xe3   :  { %v108_v2 = vpop.xlane.xlu0 %107 }
  0xe4   :  { %v109_v3 = vrot.slane %v108_v2, 4 }
  0xe6   :  { %v110_v4 = vadd.f32 %v109_v3, %v108_v2 }
  0xe7   :  { %v122_v5 = vpop.xlane.xlu0 %121 }
  0xe8   :  { %v111_v6 = vrot.slane %v110_v4, 2  ;;  %v123_v7 = vrot.slane %v122_v5, 4 }
  0xea   :  { %v124_v8 = vadd.f32 %v123_v7, %v122_v5  ;;  %v112_v9 = vadd.f32 %v111_v6, %v110_v4 }
  0xec   :  { %v125_v10 = vrot.slane %v124_v8, 2  ;;  %v113_v11 = vrot.slane %v112_v9, 1 }
  0xee   :  { %v126_v12 = vadd.f32 %v125_v10, %v124_v8  ;;  %v114_v13 = vadd.f32 %v113_v11, %v112_v9 }
  0xf0   :  { %150 = vpush %v114_v13  ;;  %v127_v14 = vrot.slane %v126_v12, 1 }
  0xf2   :  { %v128_v15 = vadd.f32 %v127_v14, %v126_v12 }
  0xf4   :  { %152 = vpush %v128_v15 }
 0x121   :  { %s151_s1 = spop %150 }
 0x122   :  { %117 = sst [smem:[#allocation7]] %s151_s1 }
 0x125   :  { %s153_s6 = spop %152 }
 0x126   :  { %131 = sst [smem:[#allocation7 + $0x1]] %s153_s6 }
 0x127   :  { %224 = shalt.err (!%p221_p4)
}
 0x128   :  { %s235_s14 = smov [#allocation7]  }
 0x129   :  { %142 = dma.smem_to_hbm %s235_s14, 16, %s289_s2, [#allocation4]  }
 0x12a   :  { %229 = dma.done.wait [#allocation4], 16  }
 0x12b   :  { %230 = vsyncadd [#allocation4], 4294967280 }
 0x12c   :  { %146 = sfence }
 0x12d   :  { %147 = vsyncpa [#allocation3], 1 }
 0x12e   :  { %148 = vsyncpa [#allocation6], 1 }
 0x12f   :  { %149 = vsyncpa [#allocation4], 1 }

</bundles_post_ra>
